<compile_context>
chip_gen: v7x
topology: tpu7x:2x2x1
jax: 0.10.0
libtpu: 0.0.40
codegen_flags: <defaults>
</compile_context>

<pallas_src>
import functools
from itertools import permutations

import jax
import jax.numpy as jnp
from jax import lax
from jax.experimental import pallas as pl
from jax.experimental.pallas import tpu as pltpu


def _round_up(x, m):
    return ((x + m - 1) // m) * m


def _tpu_limits():
    """(vmem_capacity_bytes, num_tensorcores) with safe fallbacks."""
    vmem_cap = 128 * 1024 * 1024
    num_cores = 1
    try:
        info = pltpu.get_tpu_info()
        vmem_cap = int(getattr(info, "vmem_capacity_bytes", vmem_cap))
        for name in ("num_cores", "core_count", "num_tensorcores",
                     "tensorcore_count", "num_tensor_cores"):
            v = getattr(info, name, None)
            if v:
                num_cores = int(v)
                break
    except Exception:
        pass
    return vmem_cap, num_cores


def _pick_tile_n(n, num_src, max_tile_n, elem_bytes, vmem_cap_bytes):
    """Largest 128-multiple N tile fitting a generation-aware VMEM budget.

    Returns (tile_n, vmem_limit_bytes).  Budget = 1/4 of physical VMEM so the
    2-inputs x 2-buffers working set keeps double-buffering headroom on v7x (64 MiB)
    as well as v5e/v6e (128 MiB).
    """
    sublane = 8 * (4 // elem_bytes)                 # f32 -> 8, bf16 -> 16
    s_pad = _round_up(num_src, sublane)             # sublane padding in VMEM
    per_lane_bytes = 2 * 2 * s_pad * elem_bytes     # 2 inputs x 2 buffers
    budget = max(vmem_cap_bytes // 4, 8 << 20)
    cap = max(128, (budget // per_lane_bytes) // 128 * 128)
    tile = min(max_tile_n, cap, _round_up(n, 128))
    tile = max(128, (tile // 128) * 128)
    needed = per_lane_bytes * tile
    vmem_limit = int(min(vmem_cap_bytes, max(32 << 20, needed + (8 << 20))))
    return tile, vmem_limit


def _pairwise_sqerr_kernel(est_ref, tgt_ref, out_ref, acc_ref, *,
                           n_valid, tile_n, ragged):
    """Accumulate M_sum[i, j] = sum_n (est[i, n] - tgt[j, n])^2 over N tiles.

    est_ref/tgt_ref block: (1, S, tile_n)   (S on sublanes, N on lanes), bf16 or f32
    out_ref block:         (1, 1, S, S)     written once, on the last N step
    acc_ref scratch:       (S, S) f32       resident across the N-reduction axis
    """
    n_idx = pl.program_id(2)

    @pl.when(n_idx == 0)
    def _():
        acc_ref[...] = jnp.zeros_like(acc_ref)

    # Upcast to f32 in-register (cheap) so accumulation stays f32 even with bf16
    # HBM storage; also keeps v5e (no bf16 VALU) on its fast path.
    e = est_ref[0].astype(jnp.float32)  # (S, tile_n)
    t = tgt_ref[0].astype(jnp.float32)  # (S, tile_n)

    if ragged:
        # Only emitted when N % tile_n != 0: zero the out-of-range lanes of BOTH
        # operands on the (globally) last tile, so they contribute exactly 0 to
        # (e - t)^2.  Non-last tiles get an all-true mask (rem >= tile_n).
        global_tile = pl.program_id(1) * pl.num_programs(2) + n_idx
        rem = n_valid - global_tile * tile_n
        lane = lax.broadcasted_iota(jnp.int32, e.shape, 1)
        mask = lane < rem
        zero = jnp.zeros_like(e)
        e = jnp.where(mask, e, zero)
        t = jnp.where(mask, t, zero)

    num_src = e.shape[0]
    # Direct (e - t)^2: VPU subtract/multiply + lane reduction. No cancellation,
    # no MXU needed (S is tiny; kernel is HBM-bandwidth bound).
    cols = []
    for j in range(num_src):  # static unroll, S is small
        d = e - t[j:j + 1, :]                                   # (S, tile_n), sublane bcast
        cols.append(jnp.sum(d * d, axis=-1, keepdims=True))     # (S, 1)
    acc_ref[...] += jnp.concatenate(cols, axis=-1)              # (S, S): [i, j]

    @pl.when(n_idx == pl.num_programs(2) - 1)
    def _():
        out_ref[0, 0] = acc_ref[...]


def pairwise_mean_sqerr(est, tgt, n_valid, *, tile_n, n_splits, vmem_limit_bytes):
    """est, tgt: (B, S, N) lane-dense (N possibly not a multiple of tile_n).

    Returns M (B, S, S): M[b, i, j] = (1/n_valid) sum_n (est[b,i,n] - tgt[b,j,n])^2.
    """
    B, S, N = est.shape
    n_tiles = pl.cdiv(N, tile_n)
    assert n_tiles % n_splits == 0
    tiles_per_split = n_tiles // n_splits
    ragged = (N % tile_n) != 0

    kernel = functools.partial(_pairwise_sqerr_kernel,
                               n_valid=n_valid, tile_n=tile_n, ragged=ragged)

    in_spec = pl.BlockSpec(
        (1, S, tile_n),
        lambda b, c, n: (b, 0, c * tiles_per_split + n))

    partial_sums = pl.pallas_call(
        kernel,
        out_shape=jax.ShapeDtypeStruct((B, n_splits, S, S), jnp.float32),
        grid_spec=pltpu.PrefetchScalarGridSpec(
            num_scalar_prefetch=0,
            grid=(B, n_splits, tiles_per_split),
            in_specs=[in_spec, in_spec],
            out_specs=pl.BlockSpec((1, 1, S, S), lambda b, c, n: (b, c, 0, 0)),
            scratch_shapes=[pltpu.VMEM((S, S), jnp.float32)],
        ),
        compiler_params=pltpu.CompilerParams(
            dimension_semantics=("parallel", "parallel", "arbitrary"),
            vmem_limit_bytes=vmem_limit_bytes,
        ),
    )(est, tgt)

    M_sum = jnp.sum(partial_sums, axis=1) if n_splits > 1 else partial_sums[:, 0]
    return M_sum / n_valid


def permutation_invariant_loss(estimates, targets, *, tile_n=262144,
                               compute_dtype=jnp.bfloat16):
    """estimates, targets: (B, T, F, S) -> scalar loss.

    Mirrors PermutationInvariantLoss(nn.MSELoss(reduce=False)).forward.
    `compute_dtype` controls the HBM storage dtype of the lane-dense copies the
    kernel streams (bf16 halves HBM traffic; accumulation is always f32).
    """
    B, T, F, S = estimates.shape
    N = T * F

    # Lane-dense layout: (B, S, N) so the long N axis sits on the 128-lane dim.
    # The dtype cast is fused into this (single) transpose fusion.
    est = jnp.transpose(estimates.reshape(B, N, S), (0, 2, 1)).astype(compute_dtype)
    tgt = jnp.transpose(targets.reshape(B, N, S), (0, 2, 1)).astype(compute_dtype)

    elem_bytes = jnp.dtype(compute_dtype).itemsize
    vmem_cap, num_cores = _tpu_limits()
    tn, vmem_limit = _pick_tile_n(N, S, tile_n, elem_bytes, vmem_cap)

    n_tiles = pl.cdiv(N, tn)
    # Split the N reduction only when the chip actually has spare TensorCores for it
    # (e.g. v7x with B == 1); otherwise skip the extra output block + JAX sum.
    n_splits = 2 if (num_cores >= 2 and B < num_cores
                     and n_tiles >= 2 and n_tiles % 2 == 0) else 1

    # Hot path: Pallas kernel.
    M = pairwise_mean_sqerr(est, tgt, N, tile_n=tn, n_splits=n_splits,
                            vmem_limit_bytes=vmem_limit)   # (B, S, S)

    # Glue: enumerate permutations, min over permutations, mean over batch.
    perms = jnp.array(list(permutations(range(S))), dtype=jnp.int32)  # (P, S)
    losses = jnp.mean(M[:, perms, jnp.arange(S)], axis=-1)            # (B, P)
    return jnp.mean(jnp.min(losses, axis=-1))


def _reference_loss(estimates, targets):
    """Pure-JAX reference replicating the PyTorch module literally (f32)."""
    B, T, F, S = estimates.shape
    est = estimates.reshape(B, T * F, S)
    tgt = targets.reshape(B, T * F, S)
    losses = []
    for p in permutations(range(S)):
        l = (est[:, :, list(p)] - tgt) ** 2          # elementwise MSE, no reduce
        l = jnp.mean(jnp.mean(l, axis=1), axis=-1)   # (B,)
        losses.append(l)
    losses = jnp.stack(losses, axis=-1)              # (B, P)
    return jnp.mean(jnp.min(losses, axis=-1))


if __name__ == "__main__":
    key = jax.random.PRNGKey(0)
    k1, k2, k3, k4 = jax.random.split(key, 4)

    loss_fn = jax.jit(permutation_invariant_loss,
                      static_argnames=("tile_n", "compute_dtype"))

    # Case 1: canonical small shape (single N tile), B=2, S=4, N=256.
    B, T, F, S = 2, 8, 32, 4
    estimates = jax.random.normal(k1, (B, T, F, S), dtype=jnp.float32)
    targets = jax.random.normal(k2, (B, T, F, S), dtype=jnp.float32)
    ref = jax.block_until_ready(_reference_loss(estimates, targets))

    #   f32 storage path: bit-level agreement with the reference algorithm.
    loss_f32 = jax.block_until_ready(
        loss_fn(estimates, targets, compute_dtype=jnp.float32))
    assert jnp.allclose(loss_f32, ref, rtol=1e-5, atol=1e-5), (loss_f32, ref)

    #   default bf16 storage path: same algorithm, quantized HBM streams.
    loss_bf16 = jax.block_until_ready(loss_fn(estimates, targets))
    assert jnp.allclose(loss_bf16, ref, rtol=5e-2, atol=5e-3), (loss_bf16, ref)

    # Case 2: exercises the ragged-last-tile mask (N=500 with tile_n=256) and the
    # (core-count-gated) split path, with a non-power-of-two number of sources.
    B2, T2, F2, S2 = 1, 10, 50, 3
    est2 = jax.random.normal(k3, (B2, T2, F2, S2), dtype=jnp.float32)
    tgt2 = jax.random.normal(k4, (B2, T2, F2, S2), dtype=jnp.float32)
    ref2 = jax.block_until_ready(_reference_loss(est2, tgt2))

    loss2_f32 = jax.block_until_ready(
        loss_fn(est2, tgt2, tile_n=256, compute_dtype=jnp.float32))
    assert jnp.allclose(loss2_f32, ref2, rtol=1e-5, atol=1e-5), (loss2_f32, ref2)

    loss2_bf16 = jax.block_until_ready(loss_fn(est2, tgt2, tile_n=256))
    assert jnp.allclose(loss2_bf16, ref2, rtol=5e-2, atol=5e-3), (loss2_bf16, ref2)

    print("KERNEL_OK")
</pallas_src>

<mosaic_0001>
module attributes {stable_mosaic.version = 11 : i64} {
  func.func @_pairwise_sqerr_kernel(%arg0: i32, %arg1: i32, %arg2: i32, %arg3: memref<1x4x256xf32, #tpu.memory_space<vmem>>, %arg4: memref<1x4x256xf32, #tpu.memory_space<vmem>>, %arg5: memref<1x1x4x4xf32, #tpu.memory_space<vmem>>, %arg6: memref<4x4xf32, #tpu.memory_space<vmem>>) attributes {dimension_semantics = [#tpu.dimension_semantics<parallel>, #tpu.dimension_semantics<parallel>, #tpu.dimension_semantics<arbitrary>], iteration_bounds = array<i64: 2, 1, 1>, scalar_prefetch = 0 : i64, scratch_operands = 1 : i64, tpu.core_type = #tpu.core_type<tc>, window_params = [{transform_indices = @transform_0, window_bounds = array<i64: 1, 4, 256>}, {transform_indices = @transform_1, window_bounds = array<i64: 1, 4, 256>}, {transform_indices = @transform_2, window_bounds = array<i64: 1, 1, 4, 4>}]} {
    %c0_i32 = arith.constant 0 : i32
    %0 = arith.cmpi eq, %arg2, %c0_i32 : i32
    %1 = arith.extui %0 : i1 to i32
    %c0_i32_0 = arith.constant 0 : i32
    %2 = arith.cmpi ne, %1, %c0_i32_0 : i32
    scf.if %2 {
      %cst_15 = arith.constant 0.000000e+00 : f32
      %38 = vector.broadcast %cst_15 : f32 to vector<4x4xf32>
      %c0_16 = arith.constant 0 : index
      %c0_17 = arith.constant 0 : index
      %39 = vector.load %arg6[%c0_16, %c0_17] : memref<4x4xf32, #tpu.memory_space<vmem>>, vector<4x4xf32>
      tpu.vector_store %arg6[%c0_16, %c0_17], %38 {strides = array<i32>} : memref<4x4xf32, #tpu.memory_space<vmem>>, vector<4x4xf32>,
    } else {
    }
    %c0 = arith.constant 0 : index
    %c0_1 = arith.constant 0 : index
    %c0_2 = arith.constant 0 : index
    %3 = vector.load %arg3[%c0, %c0_1, %c0_2] : memref<1x4x256xf32, #tpu.memory_space<vmem>>, vector<1x4x256xf32>
    %4 = vector.shape_cast %3 : vector<1x4x256xf32> to vector<4x256xf32>
    %c0_3 = arith.constant 0 : index
    %c0_4 = arith.constant 0 : index
    %c0_5 = arith.constant 0 : index
    %5 = vector.load %arg4[%c0_3, %c0_4, %c0_5] : memref<1x4x256xf32, #tpu.memory_space<vmem>>, vector<1x4x256xf32>
    %6 = vector.shape_cast %5 : vector<1x4x256xf32> to vector<4x256xf32>
    %7 = vector.extract_strided_slice %6 {offsets = [0, 0], sizes = [1, 256], strides = [1, 1]} : vector<4x256xf32> to vector<1x256xf32>
    %8 = vector.broadcast %7 : vector<1x256xf32> to vector<4x256xf32>
    %9 = arith.subf %4, %8 : vector<4x256xf32>
    %10 = arith.mulf %9, %9 : vector<4x256xf32>
    %cst = arith.constant dense<0.000000e+00> : vector<4xf32>
    %11 = vector.multi_reduction <add>, %10, %cst [1] : vector<4x256xf32> to vector<4xf32>
    %12 = vector.shape_cast %11 : vector<4xf32> to vector<4x1xf32>
    %13 = vector.extract_strided_slice %6 {offsets = [1, 0], sizes = [1, 256], strides = [1, 1]} : vector<4x256xf32> to vector<1x256xf32>
    %14 = vector.broadcast %13 : vector<1x256xf32> to vector<4x256xf32>
    %15 = arith.subf %4, %14 : vector<4x256xf32>
    %16 = arith.mulf %15, %15 : vector<4x256xf32>
    %cst_6 = arith.constant dense<0.000000e+00> : vector<4xf32>
    %17 = vector.multi_reduction <add>, %16, %cst_6 [1] : vector<4x256xf32> to vector<4xf32>
    %18 = vector.shape_cast %17 : vector<4xf32> to vector<4x1xf32>
    %19 = vector.extract_strided_slice %6 {offsets = [2, 0], sizes = [1, 256], strides = [1, 1]} : vector<4x256xf32> to vector<1x256xf32>
    %20 = vector.broadcast %19 : vector<1x256xf32> to vector<4x256xf32>
    %21 = arith.subf %4, %20 : vector<4x256xf32>
    %22 = arith.mulf %21, %21 : vector<4x256xf32>
    %cst_7 = arith.constant dense<0.000000e+00> : vector<4xf32>
    %23 = vector.multi_reduction <add>, %22, %cst_7 [1] : vector<4x256xf32> to vector<4xf32>
    %24 = vector.shape_cast %23 : vector<4xf32> to vector<4x1xf32>
    %25 = vector.extract_strided_slice %6 {offsets = [3, 0], sizes = [1, 256], strides = [1, 1]} : vector<4x256xf32> to vector<1x256xf32>
    %26 = vector.broadcast %25 : vector<1x256xf32> to vector<4x256xf32>
    %27 = arith.subf %4, %26 : vector<4x256xf32>
    %28 = arith.mulf %27, %27 : vector<4x256xf32>
    %cst_8 = arith.constant dense<0.000000e+00> : vector<4xf32>
    %29 = vector.multi_reduction <add>, %28, %cst_8 [1] : vector<4x256xf32> to vector<4xf32>
    %30 = vector.shape_cast %29 : vector<4xf32> to vector<4x1xf32>
    %c0_9 = arith.constant 0 : index
    %c0_10 = arith.constant 0 : index
    %31 = vector.load %arg6[%c0_9, %c0_10] : memref<4x4xf32, #tpu.memory_space<vmem>>, vector<4x4xf32>
    %32 = tpu.concatenate %12, %18, %24, %30 in 1 : vector<4x1xf32>, vector<4x1xf32>, vector<4x1xf32>, vector<4x1xf32> -> vector<4x4xf32>
    %33 = arith.addf %31, %32 : vector<4x4xf32>
    %c0_11 = arith.constant 0 : index
    %c0_12 = arith.constant 0 : index
    %34 = vector.load %arg6[%c0_11, %c0_12] : memref<4x4xf32, #tpu.memory_space<vmem>>, vector<4x4xf32>
    tpu.vector_store %arg6[%c0_11, %c0_12], %33 {strides = array<i32>} : memref<4x4xf32, #tpu.memory_space<vmem>>, vector<4x4xf32>,
    %c0_i32_13 = arith.constant 0 : i32
    %35 = arith.cmpi eq, %arg2, %c0_i32_13 : i32
    %36 = arith.extui %35 : i1 to i32
    %c0_i32_14 = arith.constant 0 : i32
    %37 = arith.cmpi ne, %36, %c0_i32_14 : i32
    scf.if %37 {
      %c0_15 = arith.constant 0 : index
      %c0_16 = arith.constant 0 : index
      %38 = vector.load %arg6[%c0_15, %c0_16] : memref<4x4xf32, #tpu.memory_space<vmem>>, vector<4x4xf32>
      %c0_17 = arith.constant 0 : index
      %c0_18 = arith.constant 0 : index
      %c0_19 = arith.constant 0 : index
      %c0_20 = arith.constant 0 : index
      %39 = vector.load %arg5[%c0_17, %c0_18, %c0_19, %c0_20] : memref<1x1x4x4xf32, #tpu.memory_space<vmem>>, vector<1x1x4x4xf32>
      %40 = vector.shape_cast %39 : vector<1x1x4x4xf32> to vector<4x4xf32>
      %41 = vector.shape_cast %38 : vector<4x4xf32> to vector<1x1x4x4xf32>
      tpu.vector_store %arg5[%c0_17, %c0_18, %c0_19, %c0_20], %41 {strides = array<i32>} : memref<1x1x4x4xf32, #tpu.memory_space<vmem>>, vector<1x1x4x4xf32>,
    } else {
    }
    return
  }
  func.func @transform_0(%arg0: i32, %arg1: i32, %arg2: i32) -> (i32, i32, i32) {
    %c1_i32 = arith.constant 1 : i32
    %0 = arith.muli %arg1, %c1_i32 : i32
    %1 = arith.addi %0, %arg2 : i32
    %c0_i32 = arith.constant 0 : i32
    %c0_i32_0 = arith.constant 0 : i32
    return %arg0, %c0_i32, %1 : i32, i32, i32
  }
  func.func @transform_1(%arg0: i32, %arg1: i32, %arg2: i32) -> (i32, i32, i32) {
    %c1_i32 = arith.constant 1 : i32
    %0 = arith.muli %arg1, %c1_i32 : i32
    %1 = arith.addi %0, %arg2 : i32
    %c0_i32 = arith.constant 0 : i32
    %c0_i32_0 = arith.constant 0 : i32
    return %arg0, %c0_i32, %1 : i32, i32, i32
  }
  func.func @transform_2(%arg0: i32, %arg1: i32, %arg2: i32) -> (i32, i32, i32, i32) {
    %c0_i32 = arith.constant 0 : i32
    %c0_i32_0 = arith.constant 0 : i32
    %c0_i32_1 = arith.constant 0 : i32
    return %arg0, %arg1, %c0_i32, %c0_i32_0 : i32, i32, i32, i32
  }
}

</mosaic_0001>

<bundles_post_ra>
// kernel: permutation_invariant_loss.1
= control target key start
LH: loop header
LB: loop body
LE: loop exit
PB: predicated region body
PF: predicated region fallthrough
CT: control target
= control target key end

     0   :  { %s565_s9 = smov 0   ;;  %s567_s10 = smov 0   ;;  %s616_s0 = inlined_call_operand.vmem [shape: f32[2,4,256], index: 0, kind: input, shape index: {}]   ;;  %s617_s1 = inlined_call_operand.vmem [shape: f32[2,4,256], index: 1, kind: input, shape index: {}]   ;;  %s618_s2 = inlined_call_operand.vmem [shape: f32[2,1,4,4], index: 2, kind: output, shape index: {}]  }
   0x1   :  { %s569_s11 = smov 0  }
   0x2 LB: > { %s31_s12 = sadd.s32 1, %s543_s10  ;;  %p490_p0 = scmp.ge.s32.totalorder %s547_s11, 1  ;;  %s547_s11 = sphi %s569_s11, %s12_s11   ;;  %s543_s10 = sphi %s567_s10, %s620_s10   ;;  %s539_s9 = sphi %s565_s9, %s619_s9  }
   0x3   : > { %p33_p1 = scmp.ge.s32.totalorder %s31_s12, 2  ;;  %p165_p2 = scmp.lt.s32.totalorder %s547_s11, 3 }
   0x5   : > { %s622_s12 = smov (%p33_p1, %s31_s12), 0  ;;  %p166_p3 = pnand %p490_p0, %p165_p2 }
   0x6   : > { %p206_p4 = scmp.lt.s32.totalorder (!%p166_p3), %s539_s9, 1  ;;  %v244_v0 = vlaneseq (!%p166_p3)  ;;  %vm271_vm0 = vcmask (!%p166_p3), 1043456   ;;  %vm239_vm1 = vcmask (!%p166_p3), 27648   ;;  %v549_v56 = vmov (!%p166_p3), 0.0  }
   0x7   : > { %169 = sbr.rel (%p166_p3) target bundleno = 193 (0xc1), region = 28  ;;  %240 = vst.msk [vmem:[#allocation2] sm:$0xf] (!%p166_p3), %vm239_vm1, %v549_v56  ;;  %vm374_vm2 = vcmask (!%p166_p3), 7168   ;;  %vm376_vm3 = vcmask (!%p166_p3), 15360   ;;  %vm378_vm4 = vcmask (!%p166_p3), 23552  }
   0x8   : > { %v245_v1 = vshrl.u32 (!%p166_p3), %v244_v0, 7 }
   0xa   : > { %v246_v2 = vsub.s32 (!%p166_p3), 0, %v245_v1  ;;  %v250_v3 = vsub.s32 (!%p166_p3), 4, %v245_v1  ;;  %v311_v4 = vsub.s32 (!%p166_p3), 2, %v245_v1  ;;  %v315_v5 = vsub.s32 (!%p166_p3), 6, %v245_v1 }
   0xb   : > { %v279_v6 = vsub.s32 (!%p166_p3), 1, %v245_v1  ;;  %v283_v7 = vsub.s32 (!%p166_p3), 5, %v245_v1  ;;  %v343_v8 = vsub.s32 (!%p166_p3), 3, %v245_v1  ;;  %v347_v9 = vsub.s32 (!%p166_p3), 7, %v245_v1 }
   0xe   : > { %s624_s9 = smov (!%p206_p4, %s539_s9), 1  ;;  %v373_v62 = vld [vmem:[#allocation2] sm:$0xf] }
   0xf   : > { %s498_s13 = sshll.u32 %s624_s9, 3  ;;  %s495_s20 = sshll.u32 %s624_s9, 2 }
  0x10   : > { %s225_s16 = scalar_lea.vmem %s617_s1, %s498_s13  ;;  %s213_s19 = scalar_lea.vmem %s616_s0, %s498_s13 }
  0x11   : > { %v242_v10 = vld [vmem:[%s225_s16] sm:$0xff]  ;;  %s234_s23 = scalar_lea.vmem %s618_s2, %s495_s20 }
  0x12   : > { %v247_v11 = vrot.slane %v242_v10, %v246_v2  ;;  %v251_v12 = vrot.slane %v242_v10, %v250_v3  ;;  %v312_v13 = vrot.slane %v242_v10, %v311_v4  ;;  %v316_v14 = vrot.slane %v242_v10, %v315_v5  ;;  %v241_v23 = vld [vmem:[%s213_s19] sm:$0xff] }
  0x13   : > { %v280_v15 = vrot.slane %v242_v10, %v279_v6  ;;  %v284_v16 = vrot.slane %v242_v10, %v283_v7  ;;  %v344_v17 = vrot.slane %v242_v10, %v343_v8  ;;  %v348_v18 = vrot.slane %v242_v10, %v347_v9 }
  0x14   : > { %v257_v19 = vrot.slane %v247_v11, %v246_v2  ;;  %v261_v20 = vrot.slane %v251_v12, %v246_v2  ;;  %v322_v21 = vrot.slane %v312_v13, %v311_v4  ;;  %v326_v22 = vrot.slane %v316_v14, %v311_v4 }
  0x15   : > { %v290_v24 = vrot.slane %v280_v15, %v279_v6  ;;  %v294_v25 = vrot.slane %v284_v16, %v279_v6  ;;  %v354_v26 = vrot.slane %v344_v17, %v343_v8  ;;  %v358_v27 = vrot.slane %v348_v18, %v343_v8 }
  0x16   : > { %v264_v28 = vcombine.low %v257_v19, %v261_v20  ;;  %v329_v29 = vcombine.low %v322_v21, %v326_v22 }
  0x17   : > { %v297_v30 = vcombine.low %v290_v24, %v294_v25  ;;  %v361_v31 = vcombine.low %v354_v26, %v358_v27 }
  0x18   : > { %v266_v32 = vsub.f32 %v241_v23, %v264_v28  ;;  %v331_v33 = vsub.f32 %v241_v23, %v329_v29 }
  0x19   : > { %v299_v34 = vsub.f32 %v241_v23, %v297_v30  ;;  %v363_v35 = vsub.f32 %v241_v23, %v361_v31 }
  0x1a   : > { %v267_v36 = vmul.f32 %v266_v32, %v266_v32  ;;  %v332_v37 = vmul.f32 %v331_v33, %v331_v33 }
  0x1b   : > { %v300_v38 = vmul.f32 %v299_v34, %v299_v34  ;;  %v364_v39 = vmul.f32 %v363_v35, %v363_v35 }
  0x1c   : > { %v269_v40 = vcombine.high %v267_v36, %v267_v36  ;;  %v272_v41 = vsel %vm271_vm0, %v267_v36, 0.0  ;;  %v334_v42 = vcombine.high %v332_v37, %v332_v37  ;;  %v336_v43 = vsel %vm271_vm0, %v332_v37, 0.0 }
  0x1d   : > { %v302_v44 = vcombine.high %v300_v38, %v300_v38  ;;  %v366_v45 = vcombine.high %v364_v39, %v364_v39  ;;  %v304_v48 = vsel %vm271_vm0, %v300_v38, 0.0  ;;  %v368_v49 = vsel %vm271_vm0, %v364_v39, 0.0 }
  0x1e   : > { %v273_v46 = vsel %vm271_vm0, %v269_v40, 0.0  ;;  %v337_v47 = vsel %vm271_vm0, %v334_v42, 0.0 }
  0x1f   : > { %v274_v50 = vadd.f32 %v273_v46, %v272_v41  ;;  %v338_v51 = vadd.f32 %v337_v47, %v336_v43  ;;  %v305_v52 = vsel %vm271_vm0, %v302_v44, 0.0  ;;  %v369_v53 = vsel %vm271_vm0, %v366_v45, 0.0 }
  0x20   : > { %v306_v54 = vadd.f32 %v305_v52, %v304_v48  ;;  %v370_v55 = vadd.f32 %v369_v53, %v368_v49 }
  0x21   : > { %275 = vadd.xlane.f32.xlu0 %v274_v50  ;;  %339 = vadd.xlane.f32.xlu1 %v338_v51 }
  0x25   : > { %307 = vadd.xlane.f32.xlu0 %v306_v54  ;;  %371 = vadd.xlane.f32.xlu1 %v370_v55 }
  0xae   : > { %v276_v57 = vpop.xlane.xlu0 %275  ;;  %v340_v58 = vpop.xlane.xlu1 %339 }
  0xb2   : > { %v308_v59 = vpop.xlane.xlu0 %307  ;;  %v372_v60 = vpop.xlane.xlu1 %371 }
  0xb3   : > { %v375_v61 = vsel %vm374_vm2, %v276_v57, %v308_v59 }
  0xb4   : > { %v377_v63 = vsel %vm376_vm3, %v375_v61, %v340_v58 }
  0xb5   : > { %v379_v0 = vsel %vm378_vm4, %v377_v63, %v372_v60 }
  0xb6   : > { %v380_v1 = vadd.f32 %v379_v0, %v373_v62 }
  0xb8   : > { %382 = vst.msk [vmem:[#allocation2] sm:$0xf] %vm239_vm1, %v380_v1 }
  0xbf   : > { %v386_v2 = vld [vmem:[#allocation2] sm:$0xf] }
  0xc0   : > { %387 = vst.msk [vmem:[%s234_s23] sm:$0xf] %vm239_vm1, %v386_v2 }
  0xc1 PF: > { %s12_s11 = sadd.s32 1, %s547_s11   ;;  %s619_s9 = smov %s543_s10 }
  0xc2   : > { %p9_p5 = scmp.ge.s32.totalorder %s12_s11, 4   ;;  %s620_s10 = smov %s622_s12 }
  0xc4   :  { %11 = sbr.rel (!%p9_p5) target bundleno = 2 (0x2), region = 69 }

</bundles_post_ra>
